<compile_context>
chip_gen: v5e
topology: v5e:2x2
jax: 0.10.0
libtpu: 0.0.40
codegen_flags: <defaults>
</compile_context>

<pallas_src>
from functools import lru_cache, partial

import jax
import jax.numpy as jnp
from jax import lax
from jax.experimental import pallas as pl
from jax.experimental.pallas import tpu as pltpu


# ----------------------------- helpers ------------------------------------- #

def _round_up(x, m):
    return -(-x // m) * m


def _full_spec(shape):
    # full-array block (last two block dims == full array dims -> (8,128) rule satisfied)
    return pl.BlockSpec(shape, lambda i: (0,) * len(shape))


# ----------------------------- Pallas kernel ------------------------------- #

def _make_block_kernel(N, Ho, Wo, Cout, K2P, roll_like_jnp):
    """Fused ResNetBasicBlock kernel in transposed (channels x positions) layout."""
    M = N * Ho * Wo

    def kernel(in0_ref, wA_ref, w2_ref, out_ref):
        f32 = jnp.float32

        # ---- conv1(3x3,s)+BN1  and  1x1 shortcut+BNs : ONE block-diagonal MXU matmul ----
        # wA = [[w1'| b1 | 0 ,  0        ],       in0 = [cols1 ; 1 ; 0 ; xs ; 1 ; 0]
        #       [0            , ws'| bs|0]]
        hr = jnp.dot(wA_ref[...], in0_ref[...], preferred_element_type=f32)   # (2*Cout, M)
        h1 = jnp.maximum(hr[:Cout, :], 0.0)       # ReLU(BN1(conv1(x)))   (Cout, M)
        res = hr[Cout:, :]                        # BNs(conv1x1(x))       (Cout, M)

        # ---- conv2 (3x3, stride 1, pad 1) taps built from the resident h1 (XLU rolls) ---
        # column m encodes (n, i, j); tap (dh, dw) needs column m + dh*Wo + dw, with a
        # boundary-validity mask (also kills every cross-image wrap-around column).
        m_idx = lax.broadcasted_iota(jnp.int32, (Cout, M), 1)
        i_idx = (m_idx // Wo) % Ho
        j_idx = m_idx % Wo
        row_ok = {-1: i_idx > 0, 0: None, 1: i_idx < Ho - 1}
        col_ok = {-1: j_idx > 0, 0: None, 1: j_idx < Wo - 1}

        taps = []
        for dh in (-1, 0, 1):
            for dw in (-1, 0, 1):
                off = dh * Wo + dw
                if off == 0:
                    shifted = h1
                else:
                    shift = ((-off) % M) if roll_like_jnp else (off % M)
                    shifted = pltpu.roll(h1, shift=shift, axis=1)          # XLU lane rotate
                r, c = row_ok[dh], col_ok[dw]
                valid = r if c is None else (c if r is None else (r & c))
                taps.append(shifted if valid is None else jnp.where(valid, shifted, 0.0))

        # bias/pad block: row 0 = 1.0 (multiplies the b2 column of w2), rest zeros.
        bias_block = (lax.broadcasted_iota(jnp.int32, (K2P - 9 * Cout, M), 0) == 0).astype(f32)

        # single consolidated (Cout, K2P) @ (K2P, M) matmul for conv2 + BN2, then ReLU.
        tap_mat = jnp.concatenate(taps + [bias_block], axis=0).astype(jnp.bfloat16)  # (K2P, M)
        h2 = jnp.maximum(jnp.dot(w2_ref[...], tap_mat, preferred_element_type=f32), 0.0)

        # residual add (NO ReLU after the add, per ResidualBlock.forward) -> lane-dense store
        out_ref[...] = h2 + res

    return kernel


def fused_resnet_block(in0, wA, w2f, *, N, Ho, Wo, Cout, roll_like_jnp):
    M = N * Ho * Wo
    K2P = w2f.shape[1]
    operands = (in0, wA, w2f)

    flops = 2 * M * (wA.shape[0] * wA.shape[1] + Cout * K2P)
    bytes_accessed = sum(a.size * a.dtype.itemsize for a in operands) + M * Cout * 4

    return pl.pallas_call(
        _make_block_kernel(N, Ho, Wo, Cout, K2P, roll_like_jnp),
        out_shape=jax.ShapeDtypeStruct((Cout, M), jnp.float32),
        grid=(1,),
        in_specs=[_full_spec(a.shape) for a in operands],
        out_specs=_full_spec((Cout, M)),
        compiler_params=pltpu.CompilerParams(dimension_semantics=("arbitrary",)),
        cost_estimate=pl.CostEstimate(flops=int(flops), transcendentals=0,
                                      bytes_accessed=int(bytes_accessed)),
    )(*operands)


@lru_cache(maxsize=1)
def detect_roll_like_jnp():
    """pltpu.roll is expected to match jnp.roll (out[:, i] = x[:, i - shift]).  Probe once
    per process (cached) so the statically-baked tap shifts are robust either way."""
    def kernel(x_ref, o_ref):
        o_ref[...] = pltpu.roll(x_ref[...], shift=1, axis=1)

    x = jnp.broadcast_to(jnp.arange(128, dtype=jnp.float32), (8, 128))
    y = pl.pallas_call(
        kernel,
        out_shape=jax.ShapeDtypeStruct((8, 128), jnp.float32),
        grid=(1,),
        in_specs=[_full_spec((8, 128))],
        out_specs=_full_spec((8, 128)),
    )(x)
    return bool(y[0, 1] == 0.0)     # jnp.roll convention: y[:,1] == x[:,0] == 0


# ------------------------------ parameter prep ------------------------------ #

def bn_fold(gamma, beta, mean, var, eps=1e-5):
    scale = gamma / jnp.sqrt(var + eps)
    bias = beta - mean * scale
    return scale, bias


def init_params(key, cin, cout):
    keys = jax.random.split(key, 15)

    def bn(kg, kb, km, kv, c):
        gamma = 1.0 + 0.1 * jax.random.normal(kg, (c,), jnp.float32)
        beta = 0.1 * jax.random.normal(kb, (c,), jnp.float32)
        mean = 0.1 * jax.random.normal(km, (c,), jnp.float32)
        var = jnp.abs(jax.random.normal(kv, (c,), jnp.float32)) + 0.5
        return bn_fold(gamma, beta, mean, var)

    w1 = 0.1 * jax.random.normal(keys[0], (3, 3, cin, cout), jnp.float32)    # HWIO
    w2 = 0.1 * jax.random.normal(keys[1], (3, 3, cout, cout), jnp.float32)   # HWIO
    ws = 0.1 * jax.random.normal(keys[2], (1, 1, cin, cout), jnp.float32)    # HWIO (1x1)
    s1, b1 = bn(*keys[3:7], cout)
    s2, b2 = bn(*keys[7:11], cout)
    ss, bs = bn(*keys[11:15], cout)
    stride = 2 if cin != cout else 1          # ResNetLayer: downsampling=2 iff in != out
    return dict(w1=w1, w2=w2, ws=ws, s1=s1, b1=b1, s2=s2, b2=b2, ss=ss, bs=bs,
                stride=stride, has_shortcut=(cin != cout))


def prepare_kernel_params(p):
    """One-time prep: fold BN scales AND biases into the conv weights (bias column paired
    with a 1.0 input row), build the block-diagonal conv1+shortcut weight and the
    consolidated conv2 weight, pad contraction dims to bf16 sublane multiples, cast bf16."""
    w1, w2, ws = p["w1"], p["w2"], p["ws"]
    Cin, Cout = w1.shape[2], w1.shape[3]
    s1, b1 = p["s1"], p["b1"]
    s2, b2 = p["s2"], p["b2"]

    K1 = 9 * Cin
    K1P = _round_up(K1 + 1, 16)               # conv1 taps | bias col | zero pad
    Ks = Cin
    KsP = _round_up(Ks + 1, 16)               # shortcut   | bias col | zero pad
    KA = K1P + KsP

    w1_T = (w1.reshape(K1, Cout) * s1[None, :]).T                       # (Cout, 9*Cin)
    if p["has_shortcut"]:
        ss, bs = p["ss"], p["bs"]
        ws_T = (ws.reshape(Cin, Cout) * ss[None, :]).T                  # (Cout, Cin)
    else:                                                               # identity residual
        ws_T = jnp.eye(Cout, Cin, dtype=jnp.float32)
        bs = jnp.zeros((Cout,), jnp.float32)

    wA = jnp.zeros((2 * Cout, KA), jnp.float32)
    wA = wA.at[:Cout, :K1].set(w1_T)
    wA = wA.at[:Cout, K1].set(b1)
    wA = wA.at[Cout:, K1P:K1P + Ks].set(ws_T)
    wA = wA.at[Cout:, K1P + Ks].set(bs)

    # conv2: (t, c_in, c_out) scaled by s2 -> (c_out, t*Cout + c_in), bias in column 9*Cout.
    K2 = 9 * Cout
    K2P = _round_up(K2 + 1, 16)
    w2_T = jnp.transpose(w2.reshape(9, Cout, Cout) * s2[None, None, :], (2, 0, 1))
    w2f = jnp.zeros((Cout, K2P), jnp.float32)
    w2f = w2f.at[:, :K2].set(w2_T.reshape(Cout, K2))
    w2f = w2f.at[:, K2].set(b2)

    return dict(wA=wA.astype(jnp.bfloat16), w2f=w2f.astype(jnp.bfloat16))


# ------------------------------ forward wrapper ------------------------------ #

@partial(jax.jit, static_argnames=("roll_like_jnp",))
def resnet_layer_forward(x_nchw, kp, *, roll_like_jnp=True):
    """Pallas-backed forward of ResNetLayer(in, out, n=1). Input/output: NCHW float32."""
    N, Cin, H, W = x_nchw.shape
    Cout = kp["wA"].shape[0] // 2
    s = 2 if Cin != Cout else 1
    Ho, Wo = H // s, W // s
    M = N * Ho * Wo

    K1 = 9 * Cin
    K1P = _round_up(K1 + 1, 16)
    Ks = Cin
    KsP = _round_up(Ks + 1, 16)

    # channel-major once; im2col taps then need no per-tap transpose.
    x_c = jnp.transpose(x_nchw, (1, 0, 2, 3)).astype(jnp.float32)        # (Cin, N, H, W)
    x_pad = jnp.pad(x_c, ((0, 0), (0, 0), (1, 1), (1, 1)))

    # conv1 im2col rows in (kh, kw, c) order + shortcut input, transposed (lane axis = M).
    rows = [x_pad[:, :, kh:kh + s * Ho:s, kw:kw + s * Wo:s].reshape(Cin, M)
            for kh in range(3) for kw in range(3)]                        # 9 x (Cin, M)
    xs = x_c[:, :, ::s, ::s].reshape(Cin, M)

    onesM = jnp.ones((1, M), jnp.float32)
    in0 = jnp.concatenate(
        rows + [onesM, jnp.zeros((K1P - K1 - 1, M), jnp.float32),
                xs, onesM, jnp.zeros((KsP - Ks - 1, M), jnp.float32)],
        axis=0).astype(jnp.bfloat16)                                      # (K1P+KsP, M)

    y_T = fused_resnet_block(in0, kp["wA"], kp["w2f"],
                             N=N, Ho=Ho, Wo=Wo, Cout=Cout, roll_like_jnp=roll_like_jnp)

    # (Cout, N*Ho*Wo) -> NCHW (tiny layout fixup done by XLA).
    return jnp.transpose(y_T.reshape(Cout, N, Ho, Wo), (1, 0, 2, 3))


def reference_forward(x_nchw, p):
    """Pure-JAX reference (lax convolutions), same eval-mode semantics."""
    x = jnp.transpose(x_nchw, (0, 2, 3, 1)).astype(jnp.float32)
    s = p['stride']
    dn = ('NHWC', 'HWIO', 'NHWC')
    prec = lax.Precision.HIGHEST
    h = lax.conv_general_dilated(x, p['w1'], (s, s), ((1, 1), (1, 1)),
                                 dimension_numbers=dn, precision=prec)
    h = jnp.maximum(h * p['s1'] + p['b1'], 0.0)
    h2 = lax.conv_general_dilated(h, p['w2'], (1, 1), ((1, 1), (1, 1)),
                                  dimension_numbers=dn, precision=prec)
    h2 = jnp.maximum(h2 * p['s2'] + p['b2'], 0.0)
    if p['has_shortcut']:
        r = lax.conv_general_dilated(x, p['ws'], (s, s), ((0, 0), (0, 0)),
                                     dimension_numbers=dn, precision=prec)
        r = r * p['ss'] + p['bs']
    else:
        r = x
    return jnp.transpose(h2 + r, (0, 3, 1, 2))


if __name__ == "__main__":
    key = jax.random.PRNGKey(0)
    N, Cin, H, W = 2, 4, 16, 16
    Cout = 8
    kx, kparam = jax.random.split(key)

    x = jax.random.normal(kx, (N, Cin, H, W), jnp.float32)
    params = init_params(kparam, Cin, Cout)
    kp = prepare_kernel_params(params)

    roll_like_jnp = detect_roll_like_jnp()

    y = resnet_layer_forward(x, kp, roll_like_jnp=roll_like_jnp)
    y = jax.block_until_ready(y)

    s = params['stride']
    assert y.shape == (N, Cout, H // s, W // s), y.shape

    y_ref = reference_forward(x, params)
    err = float(jnp.max(jnp.abs(y - y_ref)))
    # bf16 MXU operands (activations, weights, folded biases) with f32 accumulation;
    # observed error is O(1e-3) at these magnitudes.
    if not bool(jnp.allclose(y, y_ref, atol=2e-2, rtol=2e-2)):
        raise AssertionError(f"mismatch vs reference: max abs err = {err}")

    print("KERNEL_OK")
</pallas_src>

<mosaic_0001>
module attributes {stable_mosaic.version = 11 : i64} {
  func.func @kernel(%arg0: i32, %arg1: memref<8x128xf32, #tpu.memory_space<vmem>>, %arg2: memref<8x128xf32, #tpu.memory_space<vmem>>) attributes {dimension_semantics = [#tpu.dimension_semantics<arbitrary>], iteration_bounds = array<i64: 1>, scalar_prefetch = 0 : i64, scratch_operands = 0 : i64, tpu.core_type = #tpu.core_type<tc>, window_params = [{pipeline_mode = #tpu.pipeline_mode<synchronous>, transform_indices = @transform_0, window_bounds = array<i64: 8, 128>}, {pipeline_mode = #tpu.pipeline_mode<synchronous>, transform_indices = @transform_1, window_bounds = array<i64: 8, 128>}]} {
    %c0 = arith.constant 0 : index
    %c0_0 = arith.constant 0 : index
    %0 = vector.load %arg1[%c0, %c0_0] : memref<8x128xf32, #tpu.memory_space<vmem>>, vector<8x128xf32>
    %c1_i32 = arith.constant 1 : i32
    %1 = tpu.dynamic_rotate %0 by %c1_i32 dim 1 : vector<8x128xf32>, i32 -> vector<8x128xf32>
    %c0_1 = arith.constant 0 : index
    %c0_2 = arith.constant 0 : index
    %2 = vector.load %arg2[%c0_1, %c0_2] : memref<8x128xf32, #tpu.memory_space<vmem>>, vector<8x128xf32>
    tpu.vector_store %arg2[%c0_1, %c0_2], %1 {strides = array<i32>} : memref<8x128xf32, #tpu.memory_space<vmem>>, vector<8x128xf32>,
    return
  }
  func.func @transform_0(%arg0: i32) -> (i32, i32) {
    %c0_i32 = arith.constant 0 : i32
    %c0_i32_0 = arith.constant 0 : i32
    %c0_i32_1 = arith.constant 0 : i32
    return %c0_i32, %c0_i32_0 : i32, i32
  }
  func.func @transform_1(%arg0: i32) -> (i32, i32) {
    %c0_i32 = arith.constant 0 : i32
    %c0_i32_0 = arith.constant 0 : i32
    %c0_i32_1 = arith.constant 0 : i32
    return %c0_i32, %c0_i32_0 : i32, i32
  }
}

</mosaic_0001>

<bundles_post_ra>
// kernel: tpu_custom_call.1
= control target key start
LH: loop header
LB: loop body
LE: loop exit
PB: predicated region body
PF: predicated region fallthrough
CT: control target
= control target key end

     0   :  { %6 = vsyncpa [#allocation3], 0  ;;  %s118_s0 = inlined_call_operand.hbm [shape: f32[8,128], index: 0, kind: input, shape index: {}]   ;;  %s119_s1 = inlined_call_operand.hbm [shape: f32[8,128], index: 1, kind: output, shape index: {}]  }
   0x1   :  { %7 = vsyncpa [#allocation4], 0  ;;  %s13_s8 = sshll.u32 %s118_s0, 4  ;;  %s99_s9 = smov [#allocation2]   ;;  %s14_s8 = int_to_ptr.hbm [resolvable:$true] %s13_s8 }
   0x2   :  { %s15_s10 = sshll.u32 %s99_s9, 4  ;;  %s16_s10 = int_to_ptr.vmem [resolvable:$true] %s15_s10 }
   0x3   :  { %18 = dma.hbm_to_vmem [thread:$0]  %s14_s8, 128, %s16_s10, [#allocation3]  }
   0x4   :  { %95 = dma.done.wait [#allocation3], 128  }
   0x5   :  { %96 = vsyncadd [#allocation3], 4294967168  ;;  %v23_v0 = vld [vmem:[#allocation2] sm:$0xff]  ;;  %s100_s11 = smov 1   ;;  %s101_s12 = smov [#allocation5]  }
   0x6   :  { %24 = vrot.lane.b32.xlu0 %v23_v0, %s100_s11  ;;  %s32_s13 = sshll.u32 %s101_s12, 4  ;;  %s34_s16 = sshll.u32 %s119_s1, 4  ;;  %s33_s13 = int_to_ptr.vmem [resolvable:$true] %s32_s13  ;;  %s35_s16 = int_to_ptr.hbm [resolvable:$true] %s34_s16 }
  0x78   :  { %v25_v1 = vpop.permute.xlu0 %24 }
  0x79   :  { %26 = vst [vmem:[#allocation5] sm:$0xff] %v25_v1 }
  0x7a   :  { %37 = dma.vmem_to_hbm [thread:$0]  %s33_s13, 128, %s35_s16, [#allocation4]  }
  0x7b   :  { %97 = dma.done.wait [#allocation4], 128  }
  0x7c   :  { %98 = vsyncadd [#allocation4], 4294967168 }
  0x7d   :  { %42 = vsyncpa [#allocation3], 1 }
  0x7e   :  { %43 = vsyncpa [#allocation4], 1 }

</bundles_post_ra>
